<compile_context>
chip_gen: v6e
topology: v6e:2x2x1
jax: 0.10.0
libtpu: 0.0.40
codegen_flags: <defaults>
</compile_context>

<pallas_src>
import functools

import jax
import jax.numpy as jnp
from jax.experimental import pallas as pl
from jax.experimental.pallas import tpu as pltpu


_NEG_LARGE = -1e30  # padded-class bias: exp() underflows to 0 in the logsumexp


def _round_up(x, m):
    return ((x + m - 1) // m) * m


def _perceptron_kernel(x_ref, w1_ref, b1_ref, w2_ref, b2_ref, o_ref, h_acc_ref,
                       *, activation, k_true, tk, num_k):
    # x: [TILE_B, tk] f32, w1: [tk, Hp] bf16, b1: [1, Hp] f32,
    # w2: [Hp, Ap] bf16, b2: [1, Ap] f32, o: [TILE_B, Ap] f32,
    # h_acc: [TILE_B, Hp] f32 accumulator (resident across the K grid axis).
    k = pl.program_id(1)

    @pl.when(k == 0)
    def _init():
        h_acc_ref[...] = jnp.zeros_like(h_acc_ref)

    x = x_ref[...]
    if num_k * tk > k_true:
        # The rightmost K block extends past the true feature count; its OOB
        # columns hold unspecified data.  Zero them so they cannot contaminate
        # the contraction (w1's padded rows are zero as well).
        col = jax.lax.broadcasted_iota(jnp.int32, x.shape, 1) + k * tk
        x = jnp.where(col < k_true, x, 0.0)

    # Cast x to bf16 on the VPU (hidden under the MXU); accumulate in f32.
    h_acc_ref[...] += jnp.dot(x.astype(w1_ref.dtype), w1_ref[...],
                              preferred_element_type=jnp.float32)

    @pl.when(k == num_k - 1)
    def _finalize():
        h = h_acc_ref[...] + b1_ref[...]          # f32 bias add
        if activation == "relu":
            h = jnp.maximum(h, 0.0)
        elif activation == "tanh":
            h = jnp.tanh(h)
        # NOTE: h is re-rounded to bf16 for the second MXU matmul (PyTorch's
        # pure-f32 forward has no such rounding); accumulation, bias add and
        # the log_softmax all stay in f32.
        logits = jnp.dot(h.astype(w2_ref.dtype), w2_ref[...],
                         preferred_element_type=jnp.float32) + b2_ref[...]
        # Numerically stable log_softmax over the lane-dense class axis.
        # Padded classes carry a ~-1e30 bias, so exp(shifted) is exactly 0.
        m = jnp.max(logits, axis=1, keepdims=True)
        shifted = logits - m
        lse = jnp.log(jnp.sum(jnp.exp(shifted), axis=1, keepdims=True))
        o_ref[...] = (shifted - lse).astype(o_ref.dtype)


def prepare_perceptron_params(w1, b1, w2, b2):
    """One-time parameter prep: pad feature/hidden/class dims to multiples of
    128 and cast the weights to bf16.  Doing this once per parameter set keeps
    the per-forward path free of extra HBM passes over the weights."""
    w1 = jnp.asarray(w1, jnp.float32)
    w2 = jnp.asarray(w2, jnp.float32)
    b1 = jnp.asarray(b1, jnp.float32).reshape(1, -1)
    b2 = jnp.asarray(b2, jnp.float32).reshape(1, -1)
    K, H = w1.shape
    A = w2.shape[1]
    Kp, Hp, Ap = _round_up(K, 128), _round_up(H, 128), _round_up(A, 128)

    w1p = jnp.zeros((Kp, Hp), jnp.bfloat16).at[:K, :H].set(w1.astype(jnp.bfloat16))
    b1p = jnp.zeros((1, Hp), jnp.float32).at[:, :H].set(b1)
    w2p = jnp.zeros((Hp, Ap), jnp.bfloat16).at[:H, :A].set(w2.astype(jnp.bfloat16))
    # Padded class columns get a huge negative bias so they vanish from the
    # logsumexp; the forward wrapper MUST keep slicing [:, :A] of the output.
    b2p = jnp.full((1, Ap), _NEG_LARGE, jnp.float32).at[:, :A].set(b2)
    return dict(w1p=w1p, b1p=b1p, w2p=w2p, b2p=b2p, K=K, H=H, A=A)


def _vmem_budget_bytes():
    # ~75% of physical VMEM: ~48 MiB on v7x (64 MiB/TC), ~96 MiB on v5e/v6e.
    try:
        cap = pltpu.get_tpu_info().vmem_capacity_bytes
    except Exception:
        cap = 64 << 20
    return int(cap) * 3 // 4


def _vmem_needed_bytes(tile_b, tk, Hp, Ap, num_k):
    x_buf = 2 * tile_b * tk * 4                       # double-buffered f32 x tiles
    w1_buf = tk * Hp * 2 * (1 if num_k == 1 else 2)   # single-buffered when resident
    small = Hp * 4 + Hp * Ap * 2 + Ap * 4             # b1, w2, b2 (single-buffered)
    out_buf = 2 * tile_b * Ap * 4
    acc = tile_b * Hp * 4
    return x_buf + w1_buf + small + out_buf + acc


def simple_perceptron_forward(x, params, *, activation="relu", tile_b=512, tk=None):
    """x: [B, input_size] float32; params from prepare_perceptron_params().
    Returns log-probabilities [B, num_authors] in float32."""
    if activation not in (None, "relu", "tanh"):
        raise ValueError(f"unsupported activation: {activation!r}")

    x = jnp.asarray(x, jnp.float32)
    B, K = x.shape
    assert K == params["K"], "input feature size does not match the parameters"
    w1p, b1p, w2p, b2p = params["w1p"], params["b1p"], params["w2p"], params["b2p"]
    Kp, Hp = w1p.shape
    Ap = w2p.shape[1]
    A = params["A"]

    budget = _vmem_budget_bytes()

    # Batch tile: multiple of 8 sublanes, shrunk so B > 8 always yields >= 2
    # batch tiles (keeps both v7x TensorCores busy; harmless on v5e/v6e).
    tile_b = _round_up(max(8, min(tile_b, _round_up(B, 8))), 8)
    if B > 8 and pl.cdiv(B, tile_b) < 2:
        tile_b = _round_up(pl.cdiv(B, 2), 8)

    # Feature tile: keep w1 fully VMEM-resident when it fits the budget,
    # otherwise tile K on an "arbitrary" grid axis with an f32 accumulator.
    if tk is None:
        if _vmem_needed_bytes(tile_b, Kp, Hp, Ap, 1) <= budget:
            tk = Kp
        else:
            tk = 128
            for cand in (1024, 512, 256):
                if Kp % cand == 0 and _vmem_needed_bytes(tile_b, cand, Hp, Ap, 2) <= budget:
                    tk = cand
                    break
    assert tk % 128 == 0 and Kp % tk == 0, "tk must be a multiple of 128 dividing padded K"
    num_k = Kp // tk

    # Shrink the batch tile if the footprint still exceeds the budget.
    while tile_b > 8 and _vmem_needed_bytes(tile_b, tk, Hp, Ap, num_k) > budget:
        tile_b = max(8, _round_up(tile_b // 2, 8))

    needed = _vmem_needed_bytes(tile_b, tk, Hp, Ap, num_k)
    vmem_limit = int(min(budget, max(needed * 13 // 10 + (2 << 20), 32 << 20)))

    grid = (pl.cdiv(B, tile_b), num_k)
    kernel = functools.partial(_perceptron_kernel, activation=activation,
                               k_true=K, tk=tk, num_k=num_k)

    def run(single_buffer_params):
        const = pl.Buffered(1) if single_buffer_params else None
        w1_mode = const if num_k == 1 else None  # w1 blocks vary with k when K-tiled
        in_specs = [
            # x: f32, tiled over (batch, K); default double-buffered.
            # TODO(synk): bump to pl.Buffered(3) if profiling shows exposed x DMA.
            pl.BlockSpec((tile_b, tk), lambda i, k: (i, k)),
            pl.BlockSpec((tk, Hp), lambda i, k: (k, 0), pipeline_mode=w1_mode),
            pl.BlockSpec((1, Hp), lambda i, k: (0, 0), pipeline_mode=const),
            pl.BlockSpec((Hp, Ap), lambda i, k: (0, 0), pipeline_mode=const),
            pl.BlockSpec((1, Ap), lambda i, k: (0, 0), pipeline_mode=const),
        ]
        return pl.pallas_call(
            kernel,
            out_shape=jax.ShapeDtypeStruct((B, Ap), jnp.float32),
            grid=grid,
            in_specs=in_specs,
            out_specs=pl.BlockSpec((tile_b, Ap), lambda i, k: (i, 0)),
            scratch_shapes=[pltpu.VMEM((tile_b, Hp), jnp.float32)],
            compiler_params=pltpu.CompilerParams(
                dimension_semantics=("parallel", "arbitrary"),
                vmem_limit_bytes=vmem_limit),
        )(x, w1p, b1p, w2p, b2p)

    try:
        out_padded = run(True)
    except Exception:
        # Fallback for toolchains where pl.Buffered(1) single-buffering of the
        # constant-index parameter blocks is not accepted.
        out_padded = run(False)

    # Padded class columns hold ~-1e30-scale values; the [:, :A] slice is part
    # of the contract and must not be dropped.
    return out_padded[:, :A]


def _reference_forward(x, w1, b1, w2, b2, activation, matmul_dtype=jnp.float32):
    cast = lambda a: a.astype(matmul_dtype).astype(jnp.float32)
    h = cast(x) @ cast(w1) + b1.reshape(1, -1)
    if activation == "relu":
        h = jnp.maximum(h, 0.0)
    elif activation == "tanh":
        h = jnp.tanh(h)
    logits = cast(h) @ cast(w2) + b2.reshape(1, -1)
    return jax.nn.log_softmax(logits, axis=1)


if __name__ == "__main__":
    key = jax.random.PRNGKey(0)

    def make_case(k, batch, input_size, hidden_size, num_authors):
        kx, k1, kb1, k2, kb2 = jax.random.split(k, 5)
        x = jax.random.normal(kx, (batch, input_size), jnp.float32)
        bound1 = 1.0 / (input_size ** 0.5)
        w1 = jax.random.uniform(k1, (input_size, hidden_size), jnp.float32,
                                -bound1, bound1)
        b1 = jax.random.uniform(kb1, (hidden_size,), jnp.float32, -bound1, bound1)
        bound2 = 1.0 / (hidden_size ** 0.5)
        w2 = jax.random.uniform(k2, (hidden_size, num_authors), jnp.float32,
                                -bound2, bound2)
        b2 = jax.random.uniform(kb2, (num_authors,), jnp.float32, -bound2, bound2)
        return x, w1, b1, w2, b2

    def check(x, w1, b1, w2, b2, activation, **fwd_kwargs):
        params = prepare_perceptron_params(w1, b1, w2, b2)   # one-time prep
        out = simple_perceptron_forward(x, params, activation=activation,
                                        **fwd_kwargs)
        out = jax.block_until_ready(out)
        assert out.shape == (x.shape[0], w2.shape[1])
        # Reference with matching rounding points (bf16 matmul inputs, f32 rest).
        ref_bf16 = _reference_forward(x, w1, b1, w2, b2, activation, jnp.bfloat16)
        assert jnp.allclose(out, ref_bf16, atol=2e-4, rtol=2e-4)
        # Loose sanity check against the pure-f32 PyTorch-equivalent forward.
        ref_f32 = _reference_forward(x, w1, b1, w2, b2, activation, jnp.float32)
        assert jnp.allclose(out, ref_f32, atol=5e-2, rtol=5e-2)

    ka, kb = jax.random.split(key)
    # Ragged batch / feature dims: exercises partial boundary blocks, in-kernel
    # feature masking, and the >=2-batch-tile megacore split.
    check(*make_case(ka, 10, 35, 32, 7), "relu")
    # Forced K-tiling (tk < Kp): exercises the accumulator / pl.when path.
    check(*make_case(kb, 16, 256, 64, 10), "tanh", tk=128, tile_b=8)

    print("KERNEL_OK")
</pallas_src>

<mosaic_0001>
module attributes {stable_mosaic.version = 11 : i64} {
  func.func @_perceptron_kernel(%arg0: i32, %arg1: i32, %arg2: memref<8x128xf32, #tpu.memory_space<vmem>>, %arg3: memref<128x128xbf16, #tpu.memory_space<vmem>>, %arg4: memref<1x128xf32, #tpu.memory_space<vmem>>, %arg5: memref<128x128xbf16, #tpu.memory_space<vmem>>, %arg6: memref<1x128xf32, #tpu.memory_space<vmem>>, %arg7: memref<8x128xf32, #tpu.memory_space<vmem>>, %arg8: memref<8x128xf32, #tpu.memory_space<vmem>>) attributes {dimension_semantics = [#tpu.dimension_semantics<parallel>, #tpu.dimension_semantics<arbitrary>], iteration_bounds = array<i64: 2, 1>, scalar_prefetch = 0 : i64, scratch_operands = 1 : i64, tpu.core_type = #tpu.core_type<tc>, window_params = [{transform_indices = @transform_0, window_bounds = array<i64: 8, 128>}, {pipeline_mode = #tpu.pipeline_mode<synchronous>, transform_indices = @transform_1, window_bounds = array<i64: 128, 128>}, {pipeline_mode = #tpu.pipeline_mode<synchronous>, transform_indices = @transform_2, window_bounds = array<i64: 1, 128>}, {pipeline_mode = #tpu.pipeline_mode<synchronous>, transform_indices = @transform_3, window_bounds = array<i64: 128, 128>}, {pipeline_mode = #tpu.pipeline_mode<synchronous>, transform_indices = @transform_4, window_bounds = array<i64: 1, 128>}, {transform_indices = @transform_5, window_bounds = array<i64: 8, 128>}]} {
    %c0_i32 = arith.constant 0 : i32
    %0 = arith.cmpi eq, %arg1, %c0_i32 : i32
    %1 = arith.extui %0 : i1 to i32
    %c0_i32_0 = arith.constant 0 : i32
    %2 = arith.cmpi ne, %1, %c0_i32_0 : i32
    scf.if %2 {
      %cst_11 = arith.constant 0.000000e+00 : f32
      %21 = vector.broadcast %cst_11 : f32 to vector<8x128xf32>
      %c0_12 = arith.constant 0 : index
      %c0_13 = arith.constant 0 : index
      %22 = vector.load %arg8[%c0_12, %c0_13] : memref<8x128xf32, #tpu.memory_space<vmem>>, vector<8x128xf32>
      tpu.vector_store %arg8[%c0_12, %c0_13], %21 {strides = array<i32>} : memref<8x128xf32, #tpu.memory_space<vmem>>, vector<8x128xf32>,
    } else {
    }
    %c0 = arith.constant 0 : index
    %c0_1 = arith.constant 0 : index
    %3 = vector.load %arg2[%c0, %c0_1] : memref<8x128xf32, #tpu.memory_space<vmem>>, vector<8x128xf32>
    %4 = tpu.iota {dimensions = array<i32: 1>} : vector<8x128xi32>
    %c128_i32 = arith.constant 128 : i32
    %5 = arith.muli %arg1, %c128_i32 : i32
    %6 = vector.broadcast %5 : i32 to vector<8x128xi32>
    %7 = arith.addi %4, %6 : vector<8x128xi32>
    %c35_i32 = arith.constant 35 : i32
    %8 = vector.broadcast %c35_i32 : i32 to vector<8x128xi32>
    %9 = arith.cmpi slt, %7, %8 : vector<8x128xi32>
    %cst = arith.constant 0.000000e+00 : f32
    %10 = vector.broadcast %cst : f32 to vector<8x128xf32>
    %11 = arith.select %9, %3, %10 : vector<8x128xi1>, vector<8x128xf32>
    %c0_2 = arith.constant 0 : index
    %c0_3 = arith.constant 0 : index
    %12 = vector.load %arg8[%c0_2, %c0_3] : memref<8x128xf32, #tpu.memory_space<vmem>>, vector<8x128xf32>
    %13 = arith.truncf %11 : vector<8x128xf32> to vector<8x128xbf16>
    %c0_4 = arith.constant 0 : index
    %c0_5 = arith.constant 0 : index
    %14 = vector.load %arg3[%c0_4, %c0_5] : memref<128x128xbf16, #tpu.memory_space<vmem>>, vector<128x128xbf16>
    %cst_6 = arith.constant dense<0.000000e+00> : vector<8x128xf32>
    %15 = tpu.matmul %13, %14, %cst_6 {dimension_numbers = #tpu.dot_dimension_numbers<[1], [0], [0], [1], [0, 0, 1, 1], [], []>} : vector<8x128xbf16>, vector<128x128xbf16>, vector<8x128xf32> -> vector<8x128xf32>
    %16 = arith.addf %12, %15 : vector<8x128xf32>
    %c0_7 = arith.constant 0 : index
    %c0_8 = arith.constant 0 : index
    %17 = vector.load %arg8[%c0_7, %c0_8] : memref<8x128xf32, #tpu.memory_space<vmem>>, vector<8x128xf32>
    tpu.vector_store %arg8[%c0_7, %c0_8], %16 {strides = array<i32>} : memref<8x128xf32, #tpu.memory_space<vmem>>, vector<8x128xf32>,
    %c0_i32_9 = arith.constant 0 : i32
    %18 = arith.cmpi eq, %arg1, %c0_i32_9 : i32
    %19 = arith.extui %18 : i1 to i32
    %c0_i32_10 = arith.constant 0 : i32
    %20 = arith.cmpi ne, %19, %c0_i32_10 : i32
    scf.if %20 {
      %c0_11 = arith.constant 0 : index
      %c0_12 = arith.constant 0 : index
      %21 = vector.load %arg8[%c0_11, %c0_12] : memref<8x128xf32, #tpu.memory_space<vmem>>, vector<8x128xf32>
      %c0_13 = arith.constant 0 : index
      %c0_14 = arith.constant 0 : index
      %22 = vector.load %arg4[%c0_13, %c0_14] : memref<1x128xf32, #tpu.memory_space<vmem>>, vector<1x128xf32>
      %23 = vector.broadcast %22 : vector<1x128xf32> to vector<8x128xf32>
      %24 = arith.addf %21, %23 : vector<8x128xf32>
      %cst_15 = arith.constant 0.000000e+00 : f32
      %25 = vector.broadcast %cst_15 : f32 to vector<8x128xf32>
      %26 = arith.maximumf %24, %25 : vector<8x128xf32>
      %27 = arith.truncf %26 : vector<8x128xf32> to vector<8x128xbf16>
      %c0_16 = arith.constant 0 : index
      %c0_17 = arith.constant 0 : index
      %28 = vector.load %arg5[%c0_16, %c0_17] : memref<128x128xbf16, #tpu.memory_space<vmem>>, vector<128x128xbf16>
      %cst_18 = arith.constant dense<0.000000e+00> : vector<8x128xf32>
      %29 = tpu.matmul %27, %28, %cst_18 {dimension_numbers = #tpu.dot_dimension_numbers<[1], [0], [0], [1], [0, 0, 1, 1], [], []>} : vector<8x128xbf16>, vector<128x128xbf16>, vector<8x128xf32> -> vector<8x128xf32>
      %c0_19 = arith.constant 0 : index
      %c0_20 = arith.constant 0 : index
      %30 = vector.load %arg6[%c0_19, %c0_20] : memref<1x128xf32, #tpu.memory_space<vmem>>, vector<1x128xf32>
      %31 = vector.broadcast %30 : vector<1x128xf32> to vector<8x128xf32>
      %32 = arith.addf %29, %31 : vector<8x128xf32>
      %cst_21 = arith.constant dense<0xFF800000> : vector<8xf32>
      %33 = vector.multi_reduction <maximumf>, %32, %cst_21 [1] : vector<8x128xf32> to vector<8xf32>
      %34 = vector.shape_cast %33 : vector<8xf32> to vector<8x1xf32>
      %35 = vector.broadcast %34 : vector<8x1xf32> to vector<8x128xf32>
      %36 = arith.subf %32, %35 : vector<8x128xf32>
      %37 = math.exp %36 : vector<8x128xf32>
      %cst_22 = arith.constant dense<0.000000e+00> : vector<8xf32>
      %38 = vector.multi_reduction <add>, %37, %cst_22 [1] : vector<8x128xf32> to vector<8xf32>
      %39 = vector.shape_cast %38 : vector<8xf32> to vector<8x1xf32>
      %40 = math.log %39 : vector<8x1xf32>
      %41 = vector.broadcast %40 : vector<8x1xf32> to vector<8x128xf32>
      %42 = arith.subf %36, %41 : vector<8x128xf32>
      %c0_23 = arith.constant 0 : index
      %c0_24 = arith.constant 0 : index
      %43 = vector.load %arg7[%c0_23, %c0_24] : memref<8x128xf32, #tpu.memory_space<vmem>>, vector<8x128xf32>
      tpu.vector_store %arg7[%c0_23, %c0_24], %42 {strides = array<i32>} : memref<8x128xf32, #tpu.memory_space<vmem>>, vector<8x128xf32>,
    } else {
    }
    return
  }
  func.func @transform_0(%arg0: i32, %arg1: i32) -> (i32, i32) {
    %c0_i32 = arith.constant 0 : i32
    return %arg0, %arg1 : i32, i32
  }
  func.func @transform_1(%arg0: i32, %arg1: i32) -> (i32, i32) {
    %c0_i32 = arith.constant 0 : i32
    %c0_i32_0 = arith.constant 0 : i32
    return %arg1, %c0_i32 : i32, i32
  }
  func.func @transform_2(%arg0: i32, %arg1: i32) -> (i32, i32) {
    %c0_i32 = arith.constant 0 : i32
    %c0_i32_0 = arith.constant 0 : i32
    %c0_i32_1 = arith.constant 0 : i32
    return %c0_i32, %c0_i32_0 : i32, i32
  }
  func.func @transform_3(%arg0: i32, %arg1: i32) -> (i32, i32) {
    %c0_i32 = arith.constant 0 : i32
    %c0_i32_0 = arith.constant 0 : i32
    %c0_i32_1 = arith.constant 0 : i32
    return %c0_i32, %c0_i32_0 : i32, i32
  }
  func.func @transform_4(%arg0: i32, %arg1: i32) -> (i32, i32) {
    %c0_i32 = arith.constant 0 : i32
    %c0_i32_0 = arith.constant 0 : i32
    %c0_i32_1 = arith.constant 0 : i32
    return %c0_i32, %c0_i32_0 : i32, i32
  }
  func.func @transform_5(%arg0: i32, %arg1: i32) -> (i32, i32) {
    %c0_i32 = arith.constant 0 : i32
    %c0_i32_0 = arith.constant 0 : i32
    return %arg0, %c0_i32 : i32, i32
  }
}

module attributes {stable_mosaic.version = 11 : i64} {
  func.func @_perceptron_kernel(%arg0: i32, %arg1: i32, %arg2: memref<8x128xf32, #tpu.memory_space<vmem>>, %arg3: memref<128x128xbf16, #tpu.memory_space<vmem>>, %arg4: memref<1x128xf32, #tpu.memory_space<vmem>>, %arg5: memref<128x128xbf16, #tpu.memory_space<vmem>>, %arg6: memref<1x128xf32, #tpu.memory_space<vmem>>, %arg7: memref<8x128xf32, #tpu.memory_space<vmem>>, %arg8: memref<8x128xf32, #tpu.memory_space<vmem>>) attributes {dimension_semantics = [#tpu.dimension_semantics<parallel>, #tpu.dimension_semantics<arbitrary>], iteration_bounds = array<i64: 2, 1>, scalar_prefetch = 0 : i64, scratch_operands = 1 : i64, tpu.core_type = #tpu.core_type<tc>, window_params = [{transform_indices = @transform_0, window_bounds = array<i64: 8, 128>}, {transform_indices = @transform_1, window_bounds = array<i64: 128, 128>}, {pipeline_mode = #tpu.pipeline_mode<synchronous>, transform_indices = @transform_2, window_bounds = array<i64: 1, 128>}, {pipeline_mode = #tpu.pipeline_mode<synchronous>, transform_indices = @transform_3, window_bounds = array<i64: 128, 128>}, {pipeline_mode = #tpu.pipeline_mode<synchronous>, transform_indices = @transform_4, window_bounds = array<i64: 1, 128>}, {transform_indices = @transform_5, window_bounds = array<i64: 8, 128>}]} {
    %c0_i32 = arith.constant 0 : i32
    %0 = arith.cmpi eq, %arg1, %c0_i32 : i32
    %1 = arith.extui %0 : i1 to i32
    %c0_i32_0 = arith.constant 0 : i32
    %2 = arith.cmpi ne, %1, %c0_i32_0 : i32
    scf.if %2 {
      %cst_11 = arith.constant 0.000000e+00 : f32
      %21 = vector.broadcast %cst_11 : f32 to vector<8x128xf32>
      %c0_12 = arith.constant 0 : index
      %c0_13 = arith.constant 0 : index
      %22 = vector.load %arg8[%c0_12, %c0_13] : memref<8x128xf32, #tpu.memory_space<vmem>>, vector<8x128xf32>
      tpu.vector_store %arg8[%c0_12, %c0_13], %21 {strides = array<i32>} : memref<8x128xf32, #tpu.memory_space<vmem>>, vector<8x128xf32>,
    } else {
    }
    %c0 = arith.constant 0 : index
    %c0_1 = arith.constant 0 : index
    %3 = vector.load %arg2[%c0, %c0_1] : memref<8x128xf32, #tpu.memory_space<vmem>>, vector<8x128xf32>
    %4 = tpu.iota {dimensions = array<i32: 1>} : vector<8x128xi32>
    %c128_i32 = arith.constant 128 : i32
    %5 = arith.muli %arg1, %c128_i32 : i32
    %6 = vector.broadcast %5 : i32 to vector<8x128xi32>
    %7 = arith.addi %4, %6 : vector<8x128xi32>
    %c35_i32 = arith.constant 35 : i32
    %8 = vector.broadcast %c35_i32 : i32 to vector<8x128xi32>
    %9 = arith.cmpi slt, %7, %8 : vector<8x128xi32>
    %cst = arith.constant 0.000000e+00 : f32
    %10 = vector.broadcast %cst : f32 to vector<8x128xf32>
    %11 = arith.select %9, %3, %10 : vector<8x128xi1>, vector<8x128xf32>
    %c0_2 = arith.constant 0 : index
    %c0_3 = arith.constant 0 : index
    %12 = vector.load %arg8[%c0_2, %c0_3] : memref<8x128xf32, #tpu.memory_space<vmem>>, vector<8x128xf32>
    %13 = arith.truncf %11 : vector<8x128xf32> to vector<8x128xbf16>
    %c0_4 = arith.constant 0 : index
    %c0_5 = arith.constant 0 : index
    %14 = vector.load %arg3[%c0_4, %c0_5] : memref<128x128xbf16, #tpu.memory_space<vmem>>, vector<128x128xbf16>
    %cst_6 = arith.constant dense<0.000000e+00> : vector<8x128xf32>
    %15 = tpu.matmul %13, %14, %cst_6 {dimension_numbers = #tpu.dot_dimension_numbers<[1], [0], [0], [1], [0, 0, 1, 1], [], []>} : vector<8x128xbf16>, vector<128x128xbf16>, vector<8x128xf32> -> vector<8x128xf32>
    %16 = arith.addf %12, %15 : vector<8x128xf32>
    %c0_7 = arith.constant 0 : index
    %c0_8 = arith.constant 0 : index
    %17 = vector.load %arg8[%c0_7, %c0_8] : memref<8x128xf32, #tpu.memory_space<vmem>>, vector<8x128xf32>
    tpu.vector_store %arg8[%c0_7, %c0_8], %16 {strides = array<i32>} : memref<8x128xf32, #tpu.memory_space<vmem>>, vector<8x128xf32>,
    %c0_i32_9 = arith.constant 0 : i32
    %18 = arith.cmpi eq, %arg1, %c0_i32_9 : i32
    %19 = arith.extui %18 : i1 to i32
    %c0_i32_10 = arith.constant 0 : i32
    %20 = arith.cmpi ne, %19, %c0_i32_10 : i32
    scf.if %20 {
      %c0_11 = arith.constant 0 : index
      %c0_12 = arith.constant 0 : index
      %21 = vector.load %arg8[%c0_11, %c0_12] : memref<8x128xf32, #tpu.memory_space<vmem>>, vector<8x128xf32>
      %c0_13 = arith.constant 0 : index
      %c0_14 = arith.constant 0 : index
      %22 = vector.load %arg4[%c0_13, %c0_14] : memref<1x128xf32, #tpu.memory_space<vmem>>, vector<1x128xf32>
      %23 = vector.broadcast %22 : vector<1x128xf32> to vector<8x128xf32>
      %24 = arith.addf %21, %23 : vector<8x128xf32>
      %cst_15 = arith.constant 0.000000e+00 : f32
      %25 = vector.broadcast %cst_15 : f32 to vector<8x128xf32>
      %26 = arith.maximumf %24, %25 : vector<8x128xf32>
      %27 = arith.truncf %26 : vector<8x128xf32> to vector<8x128xbf16>
      %c0_16 = arith.constant 0 : index
      %c0_17 = arith.constant 0 : index
      %28 = vector.load %arg5[%c0_16, %c0_17] : memref<128x128xbf16, #tpu.memory_space<vmem>>, vector<128x128xbf16>
      %cst_18 = arith.constant dense<0.000000e+00> : vector<8x128xf32>
      %29 = tpu.matmul %27, %28, %cst_18 {dimension_numbers = #tpu.dot_dimension_numbers<[1], [0], [0], [1], [0, 0, 1, 1], [], []>} : vector<8x128xbf16>, vector<128x128xbf16>, vector<8x128xf32> -> vector<8x128xf32>
      %c0_19 = arith.constant 0 : index
      %c0_20 = arith.constant 0 : index
      %30 = vector.load %arg6[%c0_19, %c0_20] : memref<1x128xf32, #tpu.memory_space<vmem>>, vector<1x128xf32>
      %31 = vector.broadcast %30 : vector<1x128xf32> to vector<8x128xf32>
      %32 = arith.addf %29, %31 : vector<8x128xf32>
      %cst_21 = arith.constant dense<0xFF800000> : vector<8xf32>
      %33 = vector.multi_reduction <maximumf>, %32, %cst_21 [1] : vector<8x128xf32> to vector<8xf32>
      %34 = vector.shape_cast %33 : vector<8xf32> to vector<8x1xf32>
      %35 = vector.broadcast %34 : vector<8x1xf32> to vector<8x128xf32>
      %36 = arith.subf %32, %35 : vector<8x128xf32>
      %37 = math.exp %36 : vector<8x128xf32>
      %cst_22 = arith.constant dense<0.000000e+00> : vector<8xf32>
      %38 = vector.multi_reduction <add>, %37, %cst_22 [1] : vector<8x128xf32> to vector<8xf32>
      %39 = vector.shape_cast %38 : vector<8xf32> to vector<8x1xf32>
      %40 = math.log %39 : vector<8x1xf32>
      %41 = vector.broadcast %40 : vector<8x1xf32> to vector<8x128xf32>
      %42 = arith.subf %36, %41 : vector<8x128xf32>
      %c0_23 = arith.constant 0 : index
      %c0_24 = arith.constant 0 : index
      %43 = vector.load %arg7[%c0_23, %c0_24] : memref<8x128xf32, #tpu.memory_space<vmem>>, vector<8x128xf32>
      tpu.vector_store %arg7[%c0_23, %c0_24], %42 {strides = array<i32>} : memref<8x128xf32, #tpu.memory_space<vmem>>, vector<8x128xf32>,
    } else {
    }
    return
  }
  func.func @transform_0(%arg0: i32, %arg1: i32) -> (i32, i32) {
    %c0_i32 = arith.constant 0 : i32
    return %arg0, %arg1 : i32, i32
  }
  func.func @transform_1(%arg0: i32, %arg1: i32) -> (i32, i32) {
    %c0_i32 = arith.constant 0 : i32
    %c0_i32_0 = arith.constant 0 : i32
    return %arg1, %c0_i32 : i32, i32
  }
  func.func @transform_2(%arg0: i32, %arg1: i32) -> (i32, i32) {
    %c0_i32 = arith.constant 0 : i32
    %c0_i32_0 = arith.constant 0 : i32
    %c0_i32_1 = arith.constant 0 : i32
    return %c0_i32, %c0_i32_0 : i32, i32
  }
  func.func @transform_3(%arg0: i32, %arg1: i32) -> (i32, i32) {
    %c0_i32 = arith.constant 0 : i32
    %c0_i32_0 = arith.constant 0 : i32
    %c0_i32_1 = arith.constant 0 : i32
    return %c0_i32, %c0_i32_0 : i32, i32
  }
  func.func @transform_4(%arg0: i32, %arg1: i32) -> (i32, i32) {
    %c0_i32 = arith.constant 0 : i32
    %c0_i32_0 = arith.constant 0 : i32
    %c0_i32_1 = arith.constant 0 : i32
    return %c0_i32, %c0_i32_0 : i32, i32
  }
  func.func @transform_5(%arg0: i32, %arg1: i32) -> (i32, i32) {
    %c0_i32 = arith.constant 0 : i32
    %c0_i32_0 = arith.constant 0 : i32
    return %arg0, %c0_i32 : i32, i32
  }
}

</mosaic_0001>

<bundles_post_ra>
// kernel: tpu_custom_call.1
= control target key start
LH: loop header
LB: loop body
LE: loop exit
PB: predicated region body
PF: predicated region fallthrough
CT: control target
= control target key end

     0   :  { %s1259_s0 = inlined_call_operand.hbm [shape: f32[10,35], index: 0, kind: input, shape index: {}]   ;;  %s1260_s1 = inlined_call_operand.hbm [shape: bf16[128,128], index: 1, kind: input, shape index: {}]   ;;  %s1261_s2 = inlined_call_operand.vmem [shape: f32[1,128], index: 2, kind: input, shape index: {}]   ;;  %s1262_s3 = inlined_call_operand.hbm [shape: bf16[128,128], index: 3, kind: input, shape index: {}]   ;;  %s1263_s4 = inlined_call_operand.vmem [shape: f32[1,128], index: 4, kind: input, shape index: {}]   ;;  %s1264_s5 = inlined_call_operand.hbm [shape: f32[10,128], index: 5, kind: output, shape index: {}]  }
   0x1   :  { %1268 = sst [smem:[#allocation13_spill]] %s1260_s1 }
   0x2   :  { %10 = vsyncpa [#allocation4], 0 }
   0x3   :  { %12 = vsyncpa [#allocation4 + $0x1], 0 }
   0x4   :  { %13 = vsyncpa [#allocation7], 0 }
   0x5   :  { %14 = vsyncpa [#allocation5], 0 }
   0x6   :  { %16 = vsyncpa [#allocation5 + $0x1], 0  ;;  %s1072_s18 = smov 0   ;;  %s1074_s19 = smov 0  }
   0x7   :  { %s1076_s20 = smov 0   ;;  %s1078_s21 = smov 0  }
   0x8   :  { %s1080_s22 = smov 0   ;;  %s1082_s23 = smov 0  }
   0x9 LB: > { %s665_s24 = sadd.s32 4294967295, %s1032_s23   ;;  %s666_s25 = sadd.s32 4294967294, %s1032_s23   ;;  %s1032_s23 = sphi %s1082_s23, %s22_s23   ;;  %s1028_s22 = sphi %s1080_s22, %s1286_s22   ;;  %s1024_s21 = sphi %s1078_s21, %s1285_s21   ;;  %s1020_s20 = sphi %s1076_s20, %s1284_s20   ;;  %s1016_s19 = sphi %s1074_s19, %s1283_s19   ;;  %s1012_s18 = sphi %s1072_s18, %s1282_s18  }
   0xa   : > { %p56_p0 = scmp.ne.s32.totalorder %s1016_s19, %s1012_s18  ;;  %p1106_p1 = scmp.eq.s32.totalorder %s665_s24, 0 }
   0xb   : > { %p1110_p2 = scmp.eq.s32.totalorder %s665_s24, 1  ;;  %p175_p3 = scmp.eq.s32.totalorder %s666_s25, 1 }
   0xc   : > { %s1269_s26 = scalar_select %p1106_p1, 1, 0 }
   0xd   : > { %p1116_p4 = por %p1106_p1, %p56_p0  ;;  %p667_p5 = scmp.ge.s32.totalorder %s1032_s23, 1 }
   0xe   : > { %p1121_p6 = por %p175_p3, %p56_p0  ;;  %p182_p7 = scmp.lt.s32.totalorder %s1032_s23, 3 }
   0xf   : > { %s1271_s28 = scalar_select %p1116_p4, 1, 0 }
  0x10   : > { %s1272_s29 = scalar_select %p1121_p6, 1, 0 }
  0x11   : > { %p1126_p8 = pnand %p667_p5, %p182_p7  ;;  %s1034_s6 = smov [#allocation6]  }
  0x12   : > { %s197_s7 = sshll.u32 %s1034_s6, 4  ;;  %s1035_s9 = smov [#allocation8]   ;;  %s198_s7 = int_to_ptr.vmem [resolvable:$true] %s197_s7 }
  0x13   : > { %p773_p9 = pneg %p1126_p8  ;;  %s213_s10 = sshll.u32 %s1035_s9, 4  ;;  %s214_s10 = int_to_ptr.vmem [resolvable:$true] %s213_s10 }
  0x14   : > { %s879_s11 = scalar_lea.vmem %s198_s7, 1024  ;;  %p887_p5 = scmp.lt.s32.totalorder %s198_s7, %s198_s7 }
  0x15   : > { %p1135_p11 = pnand %p773_p9, %p1106_p1  ;;  %p880_p13 = scmp.ne.s32.totalorder %s198_s7, %s879_s11 }
  0x16   : > { %p888_p7 = scmp.lt.s32.totalorder %s879_s11, %s879_s11 }
  0x17   : > { %p870_p12 = pneg %p1135_p11 }
  0x18   : > { %p889_p10 = por %p888_p7, %p887_p5 }
  0x19   : > { %p882_p0 = pnand %p880_p13, %p870_p12 }
  0x1b   : > { %p883_p3 = pneg %p882_p0 }
  0x1d   : > { %p890_p9 = pnand %p889_p10, %p883_p3 }
  0x1f   : > { %893 = shalt.err (!%p890_p9)
}
  0x20   : > { %s1036_s12 = smov 64   ;;  %s1037_s13 = smov 4  }
  0x21   : > { %s1275_s1 = sld [smem:[#allocation13_spill]]  ;;  %s905_s16 = scalar_lea.vmem %s214_s10, 1024 }
  0x22   : > { %p906_p6 = scmp.ne.s32.totalorder %s214_s10, %s905_s16  ;;  %p913_p1 = scmp.lt.s32.totalorder %s214_s10, %s214_s10 }
  0x23   : > { %p914_p4 = scmp.lt.s32.totalorder %s905_s16, %s905_s16 }
  0x24   : > { %p908_p13 = pnand %p906_p6, %p870_p12 }
  0x25   : > { %p915_p5 = por %p914_p4, %p913_p1 }
  0x26   : > { %p909_p0 = pneg %p908_p13 }
  0x27   : > { %776 = dma.hbm_to_vmem [thread:$0]  (!%p1135_p11), %s1275_s1, 1024, %s198_s7, [#allocation7], %s1036_s12, %s1036_s12, %s1037_s13  }
  0x28   : > { %p916_p10 = pnand %p915_p5, %p909_p0 }
  0x2a   : > { %919 = shalt.err (!%p916_p10)
}
  0x2b   : > { %779 = dma.hbm_to_vmem [thread:$0]  (!%p1135_p11), %s1262_s3, 1024, %s214_s10, [#allocation7], %s1036_s12, %s1036_s12, %s1037_s13  }
  0x2c   : > { %s34_s25 = sadd.s32 1, %s1028_s22  ;;  %s43_s6 = sadd.s32 1, %s1020_s20 }
  0x2d   : > { %p36_p1 = scmp.ge.s32.totalorder %s34_s25, 2  ;;  %p50_p4 = scmp.ne.s32.totalorder %s1020_s20, %s1016_s19 }
  0x2e   : > { %p51_p6 = scmp.eq.s32.totalorder %s1032_s23, 0  ;;  %p790_p12 = scmp.lt.s32.totalorder %s1032_s23, 2 }
  0x2f   : > { %s1288_s25 = smov (%p36_p1, %s34_s25), 0  ;;  %p1167_p7 = por %p1110_p2, %p50_p4 }
  0x30   : > { %p52_p3 = por %p51_p6, %p50_p4  ;;  %s38_s8 = ssub.s32 %s1028_s22, %s1288_s25 }
  0x31   : > { %s230_s9 = sand.u32 1, %s1020_s20   ;;  %p41_p9 = scmp.eq.s32.totalorder %s38_s8, 0 }
  0x32   : > { %s671_s10 = sshll.u32 %s230_s9, 3  ;;  %s672_s11 = sshll.u32 %s1028_s22, 7 }
  0x33   : > { %s1176_s12 = scalar_select %p41_p9, %s1020_s20, %s43_s6  }
  0x34   : > { %s240_s15 = scalar_lea.hbm %s1259_s0, %s672_s11  ;;  %s234_s16 = scalar_lea.vmem [#allocation3], %s671_s10 }
  0x35   : > { %s242_s17 = sshll.u32 %s234_s16, 4  ;;  %p1183_p11 = pnand %p790_p12, %p52_p3  ;;  %s243_s17 = int_to_ptr.vmem [resolvable:$true] %s242_s17 }
  0x36   : > { %s231_s24 = scalar_lea.sflag [#allocation4], %s230_s9  ;;  %s933_s8 = scalar_lea.vmem %s243_s17, 128 }
  0x37   : > { %p922_p2 = pneg %p1183_p11  ;;  %p934_p13 = scmp.ne.s32.totalorder %s243_s17, %s933_s8 }
  0x38   : > { %s1038_s6 = smov [#allocation3]  }
  0x39   : > { %p936_p0 = pnand %p934_p13, %p922_p2  ;;  %s938_s1 = sshll.u32 %s1038_s6, 4  ;;  %s939_s1 = int_to_ptr.vmem [resolvable:$false] %s938_s1 }
  0x3a   : > { %s940_s11 = scalar_lea.vmem %s939_s1, 256  ;;  %p941_p10 = scmp.lt.s32.totalorder %s243_s17, %s939_s1 }
  0x3b   : > { %p937_p5 = pneg %p936_p0  ;;  %p942_p1 = scmp.lt.s32.totalorder %s940_s11, %s933_s8 }
  0x3d   : > { %p943_p4 = por %p942_p1, %p941_p10 }
  0x3f   : > { %p944_p6 = pnand %p943_p4, %p937_p5 }
  0x41   : > { %947 = shalt.err (!%p944_p6)
}
  0x42   : > { %783 = dma.hbm_to_vmem [thread:$0]  (!%p1183_p11), %s240_s15, 128, %s243_s17, %s231_s24  }
  0x43   : > { %251 = sbr.rel (%p1126_p8) target bundleno = 829 (0x33d), region = 40  ;;  %s1194_s9 = sand.u32 (!%p1126_p8), 1, %s1016_s19  }
  0x44   : > { %s674_s10 = sshll.u32 (!%p1126_p8), %s1194_s9, 3  ;;  %s254_s13 = scalar_lea.sflag (!%p1126_p8), [#allocation4], %s1194_s9 }
  0x45   : > { %s1200_s1 = scalar_lea.vmem (!%p1126_p8), [#allocation3], %s674_s10  ;;  %p1278_p12 = scmp.ne.s32.totalorder (!%p1126_p8), %s1271_s28, 0 }
  0x48   : > { %999 = dma.done.wait (%p1278_p12), %s254_s13, 128  }
  0x49   : > { %1001 = vsyncadd (%p1278_p12), %s254_s13, 4294967168  ;;  %p1279_p3 = scmp.ne.s32.totalorder %s1269_s26, 0 }
  0x4b   : > { %1003 = dma.done.wait (%p1279_p3), [#allocation7], 2048  }
  0x4c   : > { %1005 = vsyncadd (%p1279_p3), [#allocation7], 4294965248  ;;  %v1039_v0 = vmov 0.0   ;;  %vm1040_vm0 = vmmov 0   ;;  %v848_v1 = vld [vmem:[#allocation6 + $0x38] sm:$0xff]   ;;  %v849_v2 = vld [vmem:[#allocation6 + $0x30] sm:$0xff]   ;;  %v300_v10 = vlaneseq }
  0x4d   : > { %721 = vmatprep.subr.bf16.mxu0 %v1039_v0  ;;  %737 = vmatprep.mubr.msk.bf16.mxu0 %vm1040_vm0, %v1039_v0  ;;  %v850_v3 = vld [vmem:[#allocation6 + $0x28] sm:$0xff]   ;;  %v856_v4 = vld [vmem:[#allocation8 + $0x38] sm:$0xff]   ;;  %v851_v5 = vld [vmem:[#allocation6 + $0x20] sm:$0xff]   ;;  %s700_s15 = sshll.u32 %s1024_s21, 7  ;;  %s291_s16 = scalar_lea.vmem [#allocation9], %s674_s10 }
  0x4e   : > { %741 = vmatprep.subr.bf16.mxu1 %v1039_v0  ;;  %757 = vmatprep.mubr.msk.bf16.mxu1 %vm1040_vm0, %v1039_v0  ;;  %v857_v6 = vld [vmem:[#allocation8 + $0x30] sm:$0xff]   ;;  %v852_v7 = vld [vmem:[#allocation6 + $0x18] sm:$0xff]   ;;  %v858_v8 = vld [vmem:[#allocation8 + $0x28] sm:$0xff]   ;;  %v301_v13 = vand.u32 127, %v300_v10  ;;  %s565_s17 = sshll.u32 %s291_s16, 4  ;;  %s563_s8 = scalar_lea.hbm %s1264_s5, %s700_s15  ;;  %s566_s17 = int_to_ptr.vmem [resolvable:$true] %s565_s17 }
  0x4f   : > { %722 = vmatpush3.bf16.msra.mxu0 %v848_v1  ;;  %742 = vmatpush3.bf16.msra.mxu1 %v856_v4  ;;  %v853_v9 = vld [vmem:[#allocation6 + $0x10] sm:$0xff]   ;;  %v859_v11 = vld [vmem:[#allocation8 + $0x20] sm:$0xff]   ;;  %v854_v12 = vld [vmem:[#allocation6 + $0x8] sm:$0xff]   ;;  %s552_s6 = scalar_lea.sflag [#allocation5], %s1194_s9  ;;  %s948_s11 = scalar_lea.vmem %s566_s17, 128 }
  0x50   : > { %723 = vmatprep.subr.bf16.mxu0 %v1039_v0  ;;  %743 = vmatprep.subr.bf16.mxu1 %v1039_v0  ;;  %v860_v14 = vld [vmem:[#allocation8 + $0x18] sm:$0xff]   ;;  %v855_v15 = vld [vmem:[#allocation6] sm:$0xff]   ;;  %vm305_vm1 = vcmp.lt.s32.totalorder %v301_v13, 35  ;;  %v861_v17 = vld [vmem:[#allocation8 + $0x10] sm:$0xff]   ;;  %p949_p8 = scmp.ne.s32.totalorder %s566_s17, %s948_s11  ;;  %s1041_s13 = smov [#allocation9]  }
  0x51   : > { %v299_v16 = vld [vmem:[%s1200_s1] sm:$0xff]  ;;  %vm686_vm2 = vmpackc.low %vm305_vm1, %vm305_vm1  ;;  %v862_v19 = vld [vmem:[#allocation8 + $0x8] sm:$0xff]   ;;  %s952_s1 = sshll.u32 %s1041_s13, 4  ;;  %s953_s1 = int_to_ptr.vmem [resolvable:$false] %s952_s1 }
  0x52   : > { %v687_v18 = vpack.c.bf16 %v299_v16, %v299_v16  ;;  %v863_v20 = vld [vmem:[#allocation8] sm:$0xff]   ;;  %v689_v21 = vld [vmem:[%s1261_s2] ss:$0 sm:$0xff]  ;;  %p950_p9 = pnand %p949_p8, %p1167_p7  ;;  %s954_s21 = scalar_lea.vmem %s953_s1, 256 }
  0x53   : > { %724 = vmatpush3.bf16.msra.mxu0 %v849_v2  ;;  %744 = vmatpush3.bf16.msra.mxu1 %v857_v6  ;;  %v690_v29 = vld [vmem:[%s1263_s4] ss:$0 sm:$0xff]  ;;  %p955_p2 = scmp.lt.s32.totalorder %s566_s17, %s953_s1  ;;  %p956_p13 = scmp.lt.s32.totalorder %s954_s21, %s948_s11 }
  0x54   : > { %725 = vmatprep.subr.bf16.mxu0 %v1039_v0  ;;  %745 = vmatprep.subr.bf16.mxu1 %v1039_v0  ;;  %p951_p11 = pneg %p950_p9 }
  0x55   : > { %p957_p0 = por %p956_p13, %p955_p2 }
  0x57   : > { %726 = vmatpush3.bf16.msra.mxu0 %v850_v3  ;;  %746 = vmatpush3.bf16.msra.mxu1 %v858_v8  ;;  %p958_p5 = pnand %p957_p0, %p951_p11 }
  0x58   : > { %727 = vmatprep.subr.bf16.mxu0 %v1039_v0  ;;  %747 = vmatprep.subr.bf16.mxu1 %v1039_v0 }
  0x5b   : > { %728 = vmatpush3.bf16.msra.mxu0 %v851_v5  ;;  %748 = vmatpush3.bf16.msra.mxu1 %v859_v11 }
  0x5c   : > { %729 = vmatprep.subr.bf16.mxu0 %v1039_v0  ;;  %749 = vmatprep.subr.bf16.mxu1 %v1039_v0 }
  0x5f   : > { %730 = vmatpush3.bf16.msra.mxu0 %v852_v7  ;;  %750 = vmatpush3.bf16.msra.mxu1 %v860_v14 }
  0x60   : > { %731 = vmatprep.subr.bf16.mxu0 %v1039_v0  ;;  %751 = vmatprep.subr.bf16.mxu1 %v1039_v0 }
  0x63   : > { %732 = vmatpush3.bf16.msra.mxu0 %v853_v9  ;;  %752 = vmatpush3.bf16.msra.mxu1 %v861_v17 }
  0x64   : > { %733 = vmatprep.subr.bf16.mxu0 %v1039_v0  ;;  %753 = vmatprep.subr.bf16.mxu1 %v1039_v0 }
  0x67   : > { %734 = vmatpush3.bf16.msra.mxu0 %v854_v12  ;;  %754 = vmatpush3.bf16.msra.mxu1 %v862_v19 }
  0x68   : > { %735 = vmatprep.subr.bf16.mxu0 %v1039_v0  ;;  %755 = vmatprep.subr.bf16.mxu1 %v1039_v0 }
  0x6b   : > { %736 = vmatpush3.bf16.msra.mxu0 %v855_v15  ;;  %756 = vmatpush3.bf16.msra.mxu1 %v863_v20 }
  0x6e   : > { %738 = vmatmul.mubr.msk.bf16.vlgmr.msra.gmra.mxu0 %vm686_vm2, %v687_v18 }
 0x12e   : > { %v407_v22 = vpop.f32.mrf.mxu0 }
 0x12f   : > { %v426_v23 = vadd.f32 %v689_v21, %v407_v22 }
 0x130   : > { %v739_v24 = vpop.f32.mrf.mxu0 }
 0x131   : > { %v427_v25 = vmax.f32 %v426_v23, 0.0 }
 0x132   : > { %v410_v26 = vpop.f32.mrf.mxu0 }
 0x133   : > { %v428_v27 = vpack.c.bf16 %v427_v25, %v427_v25 }
 0x134   : > { %v740_v28 = vpop.f32.mrf.mxu0 }
 0x135   : > { %758 = vmatmul.mubr.bf16.vlgmr.msra.gmra.mxu1 %v428_v27 }
 0x1f5   : > { %v534_v30 = vpop.f32.mrf.mxu1 }
 0x1f6   : > { %v535_v31 = vadd.f32 %v690_v29, %v534_v30 }
 0x1f7   : > { %v759_v32 = vpop.f32.mrf.mxu1 }
 0x1f8   : > { %540 = vmax.xlane.f32.xlu0 %v535_v31 }
 0x1f9   : > { %v537_v33 = vpop.f32.mrf.mxu1 }
 0x1fb   : > { %v760_v34 = vpop.f32.mrf.mxu1 }
 0x281   : > { %v541_v35 = vpop.xlane.xlu0 %540 }
 0x282   : > { %v542_v36 = vsub.f32 %v535_v31, %v541_v35 }
 0x284   : > { %v543_v37 = vmul.f32 1.442695, %v542_v36 }
 0x286   : > { %864 = vpow2.f32 %v543_v37 }
 0x293   : > { %v865_v38 = vpop.eup %864 }
 0x294   : > { %545 = vadd.xlane.f32.xlu0 %v865_v38 }
 0x31d   : > { %v546_v39 = vpop.xlane.xlu0 %545 }
 0x31e   : > { %866 = vlog2.f32 %v546_v39 }
 0x32b   : > { %v867_v40 = vpop.eup %866 }
 0x32c   : > { %v548_v41 = vmul.f32 0.6931472, %v867_v40 }
 0x32e   : > { %v549_v42 = vsub.f32 %v542_v36, %v548_v41 }
 0x330   : > { %550 = vst [vmem:[%s291_s16] sm:$0xff] %v549_v42 }
 0x331   : > { %961 = shalt.err (!%p958_p5)
}
 0x332   : > { %s962_s10 = scalar_lea.hbm %s563_s8, 128  ;;  %s966_s28 = scalar_lea.hbm %s1264_s5, 256 }
 0x333   : > { %p963_p10 = scmp.ne.s32.totalorder %s563_s8, %s962_s10  ;;  %p967_p6 = scmp.lt.s32.totalorder %s563_s8, %s1264_s5 }
 0x334   : > { %p968_p12 = scmp.lt.s32.totalorder %s966_s28, %s962_s10 }
 0x335   : > { %p964_p1 = pnand %p963_p10, %p1167_p7 }
 0x336   : > { %p969_p3 = por %p968_p12, %p967_p6 }
 0x337   : > { %p965_p4 = pneg %p964_p1 }
 0x339   : > { %p970_p8 = pnand %p969_p3, %p965_p4 }
 0x33b   : > { %973 = shalt.err (!%p970_p8)
}
 0x33c   : > { %771 = dma.vmem_to_hbm [thread:$0]  (%p1167_p7), %s566_s17, 128, %s563_s8, %s552_s6  }
 0x33d PF: > { %s577_s15 = sand.u32 1, %s1012_s18   ;;  %p1280_p9 = scmp.ne.s32.totalorder %s1272_s29, 0 }
 0x33e   : > { %p1281_p11 = scmp.ge.s32.totalorder %s1032_s23, 2  ;;  %s578_s16 = scalar_lea.sflag [#allocation5], %s577_s15 }
 0x340   : > { %p785_p2 = pnand %p1281_p11, %p1280_p9 }
 0x342   : > { %p786_p13 = pneg %p785_p2 }
 0x344   : > { %1007 = dma.done.wait (%p786_p13), %s578_s16, 128  }
 0x345   : > { %1009 = vsyncadd (%p786_p13), %s578_s16, 4294967168  ;;  %s22_s23 = sadd.s32 1, %s1032_s23   ;;  %s1282_s18 = smov %s1016_s19 }
 0x346   : > { %p19_p0 = scmp.ge.s32.totalorder %s22_s23, 4   ;;  %s1283_s19 = smov %s1020_s20 }
 0x347   : > { %s1284_s20 = smov %s1176_s12  ;;  %s1285_s21 = smov %s1028_s22 }
 0x348   : > { %s1286_s22 = smov %s1288_s25  ;;  %21 = sbr.rel (!%p19_p0) target bundleno = 9 (0x9), region = 102 }
 0x34d   :  { %583 = vsyncpa [#allocation4], 1 }
 0x34e   :  { %585 = vsyncpa [#allocation4 + $0x1], 1 }
 0x34f   :  { %586 = vsyncpa [#allocation7], 1 }
 0x350   :  { %587 = vsyncpa [#allocation5], 1 }
 0x351   :  { %589 = vsyncpa [#allocation5 + $0x1], 1 }

// kernel: tpu_custom_call.1
= control target key start
LH: loop header
LB: loop body
LE: loop exit
PB: predicated region body
PF: predicated region fallthrough
CT: control target
= control target key end

     0   :  { %s1259_s0 = inlined_call_operand.hbm [shape: f32[10,35], index: 0, kind: input, shape index: {}]   ;;  %s1260_s1 = inlined_call_operand.hbm [shape: bf16[128,128], index: 1, kind: input, shape index: {}]   ;;  %s1261_s2 = inlined_call_operand.vmem [shape: f32[1,128], index: 2, kind: input, shape index: {}]   ;;  %s1262_s3 = inlined_call_operand.hbm [shape: bf16[128,128], index: 3, kind: input, shape index: {}]   ;;  %s1263_s4 = inlined_call_operand.vmem [shape: f32[1,128], index: 4, kind: input, shape index: {}]   ;;  %s1264_s5 = inlined_call_operand.hbm [shape: f32[10,128], index: 5, kind: output, shape index: {}]  }
   0x1   :  { %1268 = sst [smem:[#allocation13_spill]] %s1260_s1 }
   0x2   :  { %10 = vsyncpa [#allocation4], 0 }
   0x3   :  { %12 = vsyncpa [#allocation4 + $0x1], 0 }
   0x4   :  { %13 = vsyncpa [#allocation7], 0 }
   0x5   :  { %14 = vsyncpa [#allocation5], 0 }
   0x6   :  { %16 = vsyncpa [#allocation5 + $0x1], 0  ;;  %s1072_s18 = smov 0   ;;  %s1074_s19 = smov 0  }
   0x7   :  { %s1076_s20 = smov 0   ;;  %s1078_s21 = smov 0  }
   0x8   :  { %s1080_s22 = smov 0   ;;  %s1082_s23 = smov 0  }
   0x9 LB: > { %s665_s24 = sadd.s32 4294967295, %s1032_s23   ;;  %s666_s25 = sadd.s32 4294967294, %s1032_s23   ;;  %s1032_s23 = sphi %s1082_s23, %s22_s23   ;;  %s1028_s22 = sphi %s1080_s22, %s1286_s22   ;;  %s1024_s21 = sphi %s1078_s21, %s1285_s21   ;;  %s1020_s20 = sphi %s1076_s20, %s1284_s20   ;;  %s1016_s19 = sphi %s1074_s19, %s1283_s19   ;;  %s1012_s18 = sphi %s1072_s18, %s1282_s18  }
   0xa   : > { %p56_p0 = scmp.ne.s32.totalorder %s1016_s19, %s1012_s18  ;;  %p1106_p1 = scmp.eq.s32.totalorder %s665_s24, 0 }
   0xb   : > { %p1110_p2 = scmp.eq.s32.totalorder %s665_s24, 1  ;;  %p175_p3 = scmp.eq.s32.totalorder %s666_s25, 1 }
   0xc   : > { %s1269_s26 = scalar_select %p1106_p1, 1, 0 }
   0xd   : > { %p1116_p4 = por %p1106_p1, %p56_p0  ;;  %p667_p5 = scmp.ge.s32.totalorder %s1032_s23, 1 }
   0xe   : > { %p1121_p6 = por %p175_p3, %p56_p0  ;;  %p182_p7 = scmp.lt.s32.totalorder %s1032_s23, 3 }
   0xf   : > { %s1271_s28 = scalar_select %p1116_p4, 1, 0 }
  0x10   : > { %s1272_s29 = scalar_select %p1121_p6, 1, 0 }
  0x11   : > { %p1126_p8 = pnand %p667_p5, %p182_p7  ;;  %s1034_s6 = smov [#allocation6]  }
  0x12   : > { %s197_s7 = sshll.u32 %s1034_s6, 4  ;;  %s1035_s9 = smov [#allocation8]   ;;  %s198_s7 = int_to_ptr.vmem [resolvable:$true] %s197_s7 }
  0x13   : > { %p773_p9 = pneg %p1126_p8  ;;  %s213_s10 = sshll.u32 %s1035_s9, 4  ;;  %s214_s10 = int_to_ptr.vmem [resolvable:$true] %s213_s10 }
  0x14   : > { %s879_s11 = scalar_lea.vmem %s198_s7, 1024  ;;  %p887_p5 = scmp.lt.s32.totalorder %s198_s7, %s198_s7 }
  0x15   : > { %p1135_p11 = pnand %p773_p9, %p1106_p1  ;;  %p880_p13 = scmp.ne.s32.totalorder %s198_s7, %s879_s11 }
  0x16   : > { %p888_p7 = scmp.lt.s32.totalorder %s879_s11, %s879_s11 }
  0x17   : > { %p870_p12 = pneg %p1135_p11 }
  0x18   : > { %p889_p10 = por %p888_p7, %p887_p5 }
  0x19   : > { %p882_p0 = pnand %p880_p13, %p870_p12 }
  0x1b   : > { %p883_p3 = pneg %p882_p0 }
  0x1d   : > { %p890_p9 = pnand %p889_p10, %p883_p3 }
  0x1f   : > { %893 = shalt.err (!%p890_p9)
}
  0x20   : > { %s1036_s12 = smov 64   ;;  %s1037_s13 = smov 4  }
  0x21   : > { %s1275_s1 = sld [smem:[#allocation13_spill]]  ;;  %s905_s16 = scalar_lea.vmem %s214_s10, 1024 }
  0x22   : > { %p906_p6 = scmp.ne.s32.totalorder %s214_s10, %s905_s16  ;;  %p913_p1 = scmp.lt.s32.totalorder %s214_s10, %s214_s10 }
  0x23   : > { %p914_p4 = scmp.lt.s32.totalorder %s905_s16, %s905_s16 }
  0x24   : > { %p908_p13 = pnand %p906_p6, %p870_p12 }
  0x25   : > { %p915_p5 = por %p914_p4, %p913_p1 }
  0x26   : > { %p909_p0 = pneg %p908_p13 }
  0x27   : > { %776 = dma.hbm_to_vmem [thread:$0]  (!%p1135_p11), %s1275_s1, 1024, %s198_s7, [#allocation7], %s1036_s12, %s1036_s12, %s1037_s13  }
  0x28   : > { %p916_p10 = pnand %p915_p5, %p909_p0 }
  0x2a   : > { %919 = shalt.err (!%p916_p10)
}
  0x2b   : > { %779 = dma.hbm_to_vmem [thread:$0]  (!%p1135_p11), %s1262_s3, 1024, %s214_s10, [#allocation7], %s1036_s12, %s1036_s12, %s1037_s13  }
  0x2c   : > { %s34_s25 = sadd.s32 1, %s1028_s22  ;;  %s43_s6 = sadd.s32 1, %s1020_s20 }
  0x2d   : > { %p36_p1 = scmp.ge.s32.totalorder %s34_s25, 2  ;;  %p50_p4 = scmp.ne.s32.totalorder %s1020_s20, %s1016_s19 }
  0x2e   : > { %p51_p6 = scmp.eq.s32.totalorder %s1032_s23, 0  ;;  %p790_p12 = scmp.lt.s32.totalorder %s1032_s23, 2 }
  0x2f   : > { %s1288_s25 = smov (%p36_p1, %s34_s25), 0  ;;  %p1167_p7 = por %p1110_p2, %p50_p4 }
  0x30   : > { %p52_p3 = por %p51_p6, %p50_p4  ;;  %s38_s8 = ssub.s32 %s1028_s22, %s1288_s25 }
  0x31   : > { %s230_s9 = sand.u32 1, %s1020_s20   ;;  %p41_p9 = scmp.eq.s32.totalorder %s38_s8, 0 }
  0x32   : > { %s671_s10 = sshll.u32 %s230_s9, 3  ;;  %s672_s11 = sshll.u32 %s1028_s22, 7 }
  0x33   : > { %s1176_s12 = scalar_select %p41_p9, %s1020_s20, %s43_s6  }
  0x34   : > { %s240_s15 = scalar_lea.hbm %s1259_s0, %s672_s11  ;;  %s234_s16 = scalar_lea.vmem [#allocation3], %s671_s10 }
  0x35   : > { %s242_s17 = sshll.u32 %s234_s16, 4  ;;  %p1183_p11 = pnand %p790_p12, %p52_p3  ;;  %s243_s17 = int_to_ptr.vmem [resolvable:$true] %s242_s17 }
  0x36   : > { %s231_s24 = scalar_lea.sflag [#allocation4], %s230_s9  ;;  %s933_s8 = scalar_lea.vmem %s243_s17, 128 }
  0x37   : > { %p922_p2 = pneg %p1183_p11  ;;  %p934_p13 = scmp.ne.s32.totalorder %s243_s17, %s933_s8 }
  0x38   : > { %s1038_s6 = smov [#allocation3]  }
  0x39   : > { %p936_p0 = pnand %p934_p13, %p922_p2  ;;  %s938_s1 = sshll.u32 %s1038_s6, 4  ;;  %s939_s1 = int_to_ptr.vmem [resolvable:$false] %s938_s1 }
  0x3a   : > { %s940_s11 = scalar_lea.vmem %s939_s1, 256  ;;  %p941_p10 = scmp.lt.s32.totalorder %s243_s17, %s939_s1 }
  0x3b   : > { %p937_p5 = pneg %p936_p0  ;;  %p942_p1 = scmp.lt.s32.totalorder %s940_s11, %s933_s8 }
  0x3d   : > { %p943_p4 = por %p942_p1, %p941_p10 }
  0x3f   : > { %p944_p6 = pnand %p943_p4, %p937_p5 }
  0x41   : > { %947 = shalt.err (!%p944_p6)
}
  0x42   : > { %783 = dma.hbm_to_vmem [thread:$0]  (!%p1183_p11), %s240_s15, 128, %s243_s17, %s231_s24  }
  0x43   : > { %251 = sbr.rel (%p1126_p8) target bundleno = 829 (0x33d), region = 40  ;;  %s1194_s9 = sand.u32 (!%p1126_p8), 1, %s1016_s19  }
  0x44   : > { %s674_s10 = sshll.u32 (!%p1126_p8), %s1194_s9, 3  ;;  %s254_s13 = scalar_lea.sflag (!%p1126_p8), [#allocation4], %s1194_s9 }
  0x45   : > { %s1200_s1 = scalar_lea.vmem (!%p1126_p8), [#allocation3], %s674_s10  ;;  %p1278_p12 = scmp.ne.s32.totalorder (!%p1126_p8), %s1271_s28, 0 }
  0x48   : > { %999 = dma.done.wait (%p1278_p12), %s254_s13, 128  }
  0x49   : > { %1001 = vsyncadd (%p1278_p12), %s254_s13, 4294967168  ;;  %p1279_p3 = scmp.ne.s32.totalorder %s1269_s26, 0 }
  0x4b   : > { %1003 = dma.done.wait (%p1279_p3), [#allocation7], 2048  }
  0x4c   : > { %1005 = vsyncadd (%p1279_p3), [#allocation7], 4294965248  ;;  %v1039_v0 = vmov 0.0   ;;  %vm1040_vm0 = vmmov 0   ;;  %v848_v1 = vld [vmem:[#allocation6 + $0x38] sm:$0xff]   ;;  %v849_v2 = vld [vmem:[#allocation6 + $0x30] sm:$0xff]   ;;  %v300_v10 = vlaneseq }
  0x4d   : > { %721 = vmatprep.subr.bf16.mxu0 %v1039_v0  ;;  %737 = vmatprep.mubr.msk.bf16.mxu0 %vm1040_vm0, %v1039_v0  ;;  %v850_v3 = vld [vmem:[#allocation6 + $0x28] sm:$0xff]   ;;  %v856_v4 = vld [vmem:[#allocation8 + $0x38] sm:$0xff]   ;;  %v851_v5 = vld [vmem:[#allocation6 + $0x20] sm:$0xff]   ;;  %s700_s15 = sshll.u32 %s1024_s21, 7  ;;  %s291_s16 = scalar_lea.vmem [#allocation9], %s674_s10 }
  0x4e   : > { %741 = vmatprep.subr.bf16.mxu1 %v1039_v0  ;;  %757 = vmatprep.mubr.msk.bf16.mxu1 %vm1040_vm0, %v1039_v0  ;;  %v857_v6 = vld [vmem:[#allocation8 + $0x30] sm:$0xff]   ;;  %v852_v7 = vld [vmem:[#allocation6 + $0x18] sm:$0xff]   ;;  %v858_v8 = vld [vmem:[#allocation8 + $0x28] sm:$0xff]   ;;  %v301_v13 = vand.u32 127, %v300_v10  ;;  %s565_s17 = sshll.u32 %s291_s16, 4  ;;  %s563_s8 = scalar_lea.hbm %s1264_s5, %s700_s15  ;;  %s566_s17 = int_to_ptr.vmem [resolvable:$true] %s565_s17 }
  0x4f   : > { %722 = vmatpush3.bf16.msra.mxu0 %v848_v1  ;;  %742 = vmatpush3.bf16.msra.mxu1 %v856_v4  ;;  %v853_v9 = vld [vmem:[#allocation6 + $0x10] sm:$0xff]   ;;  %v859_v11 = vld [vmem:[#allocation8 + $0x20] sm:$0xff]   ;;  %v854_v12 = vld [vmem:[#allocation6 + $0x8] sm:$0xff]   ;;  %s552_s6 = scalar_lea.sflag [#allocation5], %s1194_s9  ;;  %s948_s11 = scalar_lea.vmem %s566_s17, 128 }
  0x50   : > { %723 = vmatprep.subr.bf16.mxu0 %v1039_v0  ;;  %743 = vmatprep.subr.bf16.mxu1 %v1039_v0  ;;  %v860_v14 = vld [vmem:[#allocation8 + $0x18] sm:$0xff]   ;;  %v855_v15 = vld [vmem:[#allocation6] sm:$0xff]   ;;  %vm305_vm1 = vcmp.lt.s32.totalorder %v301_v13, 35  ;;  %v861_v17 = vld [vmem:[#allocation8 + $0x10] sm:$0xff]   ;;  %p949_p8 = scmp.ne.s32.totalorder %s566_s17, %s948_s11  ;;  %s1041_s13 = smov [#allocation9]  }
  0x51   : > { %v299_v16 = vld [vmem:[%s1200_s1] sm:$0xff]  ;;  %vm686_vm2 = vmpackc.low %vm305_vm1, %vm305_vm1  ;;  %v862_v19 = vld [vmem:[#allocation8 + $0x8] sm:$0xff]   ;;  %s952_s1 = sshll.u32 %s1041_s13, 4  ;;  %s953_s1 = int_to_ptr.vmem [resolvable:$false] %s952_s1 }
  0x52   : > { %v687_v18 = vpack.c.bf16 %v299_v16, %v299_v16  ;;  %v863_v20 = vld [vmem:[#allocation8] sm:$0xff]   ;;  %v689_v21 = vld [vmem:[%s1261_s2] ss:$0 sm:$0xff]  ;;  %p950_p9 = pnand %p949_p8, %p1167_p7  ;;  %s954_s21 = scalar_lea.vmem %s953_s1, 256 }
  0x53   : > { %724 = vmatpush3.bf16.msra.mxu0 %v849_v2  ;;  %744 = vmatpush3.bf16.msra.mxu1 %v857_v6  ;;  %v690_v29 = vld [vmem:[%s1263_s4] ss:$0 sm:$0xff]  ;;  %p955_p2 = scmp.lt.s32.totalorder %s566_s17, %s953_s1  ;;  %p956_p13 = scmp.lt.s32.totalorder %s954_s21, %s948_s11 }
  0x54   : > { %725 = vmatprep.subr.bf16.mxu0 %v1039_v0  ;;  %745 = vmatprep.subr.bf16.mxu1 %v1039_v0  ;;  %p951_p11 = pneg %p950_p9 }
  0x55   : > { %p957_p0 = por %p956_p13, %p955_p2 }
  0x57   : > { %726 = vmatpush3.bf16.msra.mxu0 %v850_v3  ;;  %746 = vmatpush3.bf16.msra.mxu1 %v858_v8  ;;  %p958_p5 = pnand %p957_p0, %p951_p11 }
  0x58   : > { %727 = vmatprep.subr.bf16.mxu0 %v1039_v0  ;;  %747 = vmatprep.subr.bf16.mxu1 %v1039_v0 }
  0x5b   : > { %728 = vmatpush3.bf16.msra.mxu0 %v851_v5  ;;  %748 = vmatpush3.bf16.msra.mxu1 %v859_v11 }
  0x5c   : > { %729 = vmatprep.subr.bf16.mxu0 %v1039_v0  ;;  %749 = vmatprep.subr.bf16.mxu1 %v1039_v0 }
  0x5f   : > { %730 = vmatpush3.bf16.msra.mxu0 %v852_v7  ;;  %750 = vmatpush3.bf16.msra.mxu1 %v860_v14 }
  0x60   : > { %731 = vmatprep.subr.bf16.mxu0 %v1039_v0  ;;  %751 = vmatprep.subr.bf16.mxu1 %v1039_v0 }
  0x63   : > { %732 = vmatpush3.bf16.msra.mxu0 %v853_v9  ;;  %752 = vmatpush3.bf16.msra.mxu1 %v861_v17 }
  0x64   : > { %733 = vmatprep.subr.bf16.mxu0 %v1039_v0  ;;  %753 = vmatprep.subr.bf16.mxu1 %v1039_v0 }
  0x67   : > { %734 = vmatpush3.bf16.msra.mxu0 %v854_v12  ;;  %754 = vmatpush3.bf16.msra.mxu1 %v862_v19 }
  0x68   : > { %735 = vmatprep.subr.bf16.mxu0 %v1039_v0  ;;  %755 = vmatprep.subr.bf16.mxu1 %v1039_v0 }
  0x6b   : > { %736 = vmatpush3.bf16.msra.mxu0 %v855_v15  ;;  %756 = vmatpush3.bf16.msra.mxu1 %v863_v20 }
  0x6e   : > { %738 = vmatmul.mubr.msk.bf16.vlgmr.msra.gmra.mxu0 %vm686_vm2, %v687_v18 }
 0x12e   : > { %v407_v22 = vpop.f32.mrf.mxu0 }
 0x12f   : > { %v426_v23 = vadd.f32 %v689_v21, %v407_v22 }
 0x130   : > { %v739_v24 = vpop.f32.mrf.mxu0 }
 0x131   : > { %v427_v25 = vmax.f32 %v426_v23, 0.0 }
 0x132   : > { %v410_v26 = vpop.f32.mrf.mxu0 }
 0x133   : > { %v428_v27 = vpack.c.bf16 %v427_v25, %v427_v25 }
 0x134   : > { %v740_v28 = vpop.f32.mrf.mxu0 }
 0x135   : > { %758 = vmatmul.mubr.bf16.vlgmr.msra.gmra.mxu1 %v428_v27 }
 0x1f5   : > { %v534_v30 = vpop.f32.mrf.mxu1 }
 0x1f6   : > { %v535_v31 = vadd.f32 %v690_v29, %v534_v30 }
 0x1f7   : > { %v759_v32 = vpop.f32.mrf.mxu1 }
 0x1f8   : > { %540 = vmax.xlane.f32.xlu0 %v535_v31 }
 0x1f9   : > { %v537_v33 = vpop.f32.mrf.mxu1 }
 0x1fb   : > { %v760_v34 = vpop.f32.mrf.mxu1 }
 0x281   : > { %v541_v35 = vpop.xlane.xlu0 %540 }
 0x282   : > { %v542_v36 = vsub.f32 %v535_v31, %v541_v35 }
 0x284   : > { %v543_v37 = vmul.f32 1.442695, %v542_v36 }
 0x286   : > { %864 = vpow2.f32 %v543_v37 }
 0x293   : > { %v865_v38 = vpop.eup %864 }
 0x294   : > { %545 = vadd.xlane.f32.xlu0 %v865_v38 }
 0x31d   : > { %v546_v39 = vpop.xlane.xlu0 %545 }
 0x31e   : > { %866 = vlog2.f32 %v546_v39 }
 0x32b   : > { %v867_v40 = vpop.eup %866 }
 0x32c   : > { %v548_v41 = vmul.f32 0.6931472, %v867_v40 }
 0x32e   : > { %v549_v42 = vsub.f32 %v542_v36, %v548_v41 }
 0x330   : > { %550 = vst [vmem:[%s291_s16] sm:$0xff] %v549_v42 }
 0x331   : > { %961 = shalt.err (!%p958_p5)
}
 0x332   : > { %s962_s10 = scalar_lea.hbm %s563_s8, 128  ;;  %s966_s28 = scalar_lea.hbm %s1264_s5, 256 }
 0x333   : > { %p963_p10 = scmp.ne.s32.totalorder %s563_s8, %s962_s10  ;;  %p967_p6 = scmp.lt.s32.totalorder %s563_s8, %s1264_s5 }
 0x334   : > { %p968_p12 = scmp.lt.s32.totalorder %s966_s28, %s962_s10 }
 0x335   : > { %p964_p1 = pnand %p963_p10, %p1167_p7 }
 0x336   : > { %p969_p3 = por %p968_p12, %p967_p6 }
 0x337   : > { %p965_p4 = pneg %p964_p1 }
 0x339   : > { %p970_p8 = pnand %p969_p3, %p965_p4 }
 0x33b   : > { %973 = shalt.err (!%p970_p8)
}
 0x33c   : > { %771 = dma.vmem_to_hbm [thread:$0]  (%p1167_p7), %s566_s17, 128, %s563_s8, %s552_s6  }
 0x33d PF: > { %s577_s15 = sand.u32 1, %s1012_s18   ;;  %p1280_p9 = scmp.ne.s32.totalorder %s1272_s29, 0 }
 0x33e   : > { %p1281_p11 = scmp.ge.s32.totalorder %s1032_s23, 2  ;;  %s578_s16 = scalar_lea.sflag [#allocation5], %s577_s15 }
 0x340   : > { %p785_p2 = pnand %p1281_p11, %p1280_p9 }
 0x342   : > { %p786_p13 = pneg %p785_p2 }
 0x344   : > { %1007 = dma.done.wait (%p786_p13), %s578_s16, 128  }
 0x345   : > { %1009 = vsyncadd (%p786_p13), %s578_s16, 4294967168  ;;  %s22_s23 = sadd.s32 1, %s1032_s23   ;;  %s1282_s18 = smov %s1016_s19 }
 0x346   : > { %p19_p0 = scmp.ge.s32.totalorder %s22_s23, 4   ;;  %s1283_s19 = smov %s1020_s20 }
 0x347   : > { %s1284_s20 = smov %s1176_s12  ;;  %s1285_s21 = smov %s1028_s22 }
 0x348   : > { %s1286_s22 = smov %s1288_s25  ;;  %21 = sbr.rel (!%p19_p0) target bundleno = 9 (0x9), region = 102 }
 0x34d   :  { %583 = vsyncpa [#allocation4], 1 }
 0x34e   :  { %585 = vsyncpa [#allocation4 + $0x1], 1 }
 0x34f   :  { %586 = vsyncpa [#allocation7], 1 }
 0x350   :  { %587 = vsyncpa [#allocation5], 1 }
 0x351   :  { %589 = vsyncpa [#allocation5 + $0x1], 1 }

</bundles_post_ra>
